<compile_context>
chip_gen: v7x
topology: tpu7x:2x2x1
jax: 0.10.0
libtpu: 0.0.40
codegen_flags: <defaults>
</compile_context>

<pallas_src>
import functools

import jax
import jax.numpy as jnp
from jax import lax
from jax.experimental import pallas as pl
from jax.experimental.pallas import tpu as pltpu


def _round_up(x, m):
    return (x + m - 1) // m * m


def mlp_kernel(x_ref, w1_ref, b1_ref, w2_ref, b2_ref, o_ref, *, mxu_dtype, precision):
    # x_ref : [TB, D_in]           native-dtype batch tile (cast to MXU dtype here)
    # w1_ref: [D_in, H_pad]        pre-transposed [K, N] weight (bf16/f32)
    # b1_ref: [1, H_pad]           f32
    # w2_ref: [H_pad, D_out_pad]   pre-transposed [K, N] weight (bf16/f32)
    # b2_ref: [1, D_out_pad]       f32
    # o_ref : [TB, D_out_pad]      lane-dense output tile (D_out_pad % 128 == 0)
    x = x_ref[...].astype(mxu_dtype)                       # in-register cast, no HBM cost
    h = jnp.dot(x, w1_ref[...], precision=precision,
                preferred_element_type=jnp.float32)
    # Keep activation math in f32 (v5e has no bf16 VPU/EUP); exp goes to the
    # otherwise-idle EUP slot.
    h = jax.nn.sigmoid(h + b1_ref[...])
    y = jnp.dot(h.astype(w2_ref.dtype), w2_ref[...], precision=precision,
                preferred_element_type=jnp.float32)
    o_ref[...] = (y + b2_ref[...]).astype(o_ref.dtype)


def mlp_forward(x_nchw, w1, b1, w2, b2, *, mxu_dtype=jnp.bfloat16,
                out_dtype=jnp.float32):
    """Fused forward of  y = Linear2(sigmoid(Linear1(x.view(B, -1)))).

    Parameters use PyTorch nn.Linear conventions:
      w1: [hidden, in], b1: [hidden], w2: [out, hidden], b2: [out].
    mxu_dtype: dtype fed to the MXU (bf16 default = native fast path, f32 acc).
    out_dtype: HBM output dtype (bf16 halves writeback if downstream accepts it).
    """
    B = x_nchw.shape[0]
    x_flat = x_nchw.reshape(B, -1)            # == torch x.view(B, -1); no pad, no cast
    d_in = x_flat.shape[1]
    hidden = w1.shape[0]
    d_out = w2.shape[0]

    hidden_pad = _round_up(hidden, 128)       # lane-dense intermediate
    d_out_pad = _round_up(d_out, 128)         # lane-dense output store

    # Weights/biases are rewritten once anyway (pad + cast), so fuse the
    # transpose in: the MXU gets plain [K, N] operands, no in-kernel relayout.
    w1_t = jnp.pad(w1, ((0, hidden_pad - hidden), (0, 0))).T.astype(mxu_dtype)
    w2_t = jnp.pad(w2, ((0, d_out_pad - d_out),
                        (0, hidden_pad - hidden))).T.astype(mxu_dtype)
    b1_p = jnp.pad(b1, (0, hidden_pad - hidden)).reshape(1, hidden_pad).astype(jnp.float32)
    b2_p = jnp.pad(b2, (0, d_out_pad - d_out)).reshape(1, d_out_pad).astype(jnp.float32)

    # ---- batch tiling ----
    # 16-row alignment (bf16 sublane packing after the in-kernel cast); tiles up
    # to 512 rows (~85% of HBM roofline per the tile-size sweep). B > 512 gives
    # >= 2 grid steps so both v7x TensorCores are used.
    block_b = _round_up(B, 16) if B <= 512 else 512

    x_bytes = jnp.dtype(x_flat.dtype).itemsize
    out_bytes = jnp.dtype(out_dtype).itemsize
    w_bytes = jnp.dtype(mxu_dtype).itemsize

    def _vmem_need(bb):
        return (2 * bb * d_in * x_bytes                     # double-buffered x tiles
                + 2 * bb * d_out_pad * out_bytes            # double-buffered out tiles
                + 2 * (d_in * hidden_pad + hidden_pad * d_out_pad) * w_bytes  # weights
                + 2 * (hidden_pad + d_out_pad) * 4)          # biases

    budget = 40 << 20                         # conservative across gens (v7x: 64 MiB phys)
    while block_b > 16 and _vmem_need(block_b) > budget:
        block_b = _round_up(block_b // 2, 16)

    grid_b = pl.cdiv(B, block_b)              # trailing partial block is clipped

    # Raise v5e's 16 MiB scoped-VMEM default; stay under v7x's 64 MiB physical.
    vmem_limit = min(max(int(1.5 * _vmem_need(block_b)) + (4 << 20), 32 << 20),
                     64 << 20)

    # HIGHEST only matters for f32 operands; bf16 takes the native MXU path.
    precision = lax.Precision.HIGHEST if mxu_dtype == jnp.float32 else None

    out = pl.pallas_call(
        functools.partial(mlp_kernel, mxu_dtype=mxu_dtype, precision=precision),
        out_shape=jax.ShapeDtypeStruct((B, d_out_pad), out_dtype),
        grid=(grid_b,),
        in_specs=[
            pl.BlockSpec((block_b, d_in), lambda i: (i, 0)),          # x batch tile
            pl.BlockSpec((d_in, hidden_pad), lambda i: (0, 0)),       # W1^T (resident)
            pl.BlockSpec((1, hidden_pad), lambda i: (0, 0)),          # b1
            pl.BlockSpec((hidden_pad, d_out_pad), lambda i: (0, 0)),  # W2^T (resident)
            pl.BlockSpec((1, d_out_pad), lambda i: (0, 0)),           # b2
        ],
        out_specs=pl.BlockSpec((block_b, d_out_pad), lambda i: (i, 0)),
        compiler_params=pltpu.CompilerParams(
            dimension_semantics=("parallel",),   # batch tiles independent (megacore)
            vmem_limit_bytes=vmem_limit,
        ),
    )(x_flat, w1_t, b1_p, w2_t, b2_p)

    return out[:B, :d_out]


def _torch_linear_init(key, out_features, in_features):
    """Deterministic init mimicking nn.Linear default (U[-1/sqrt(fan_in), +])."""
    kw, kb = jax.random.split(key)
    bound = 1.0 / jnp.sqrt(jnp.float32(in_features))
    w = jax.random.uniform(kw, (out_features, in_features), jnp.float32,
                           minval=-bound, maxval=bound)
    b = jax.random.uniform(kb, (out_features,), jnp.float32,
                           minval=-bound, maxval=bound)
    return w, b


if __name__ == "__main__":
    key = jax.random.PRNGKey(0)
    k_x, k_l1, k_l2 = jax.random.split(key, 3)

    # Small shapes consistent with the module: x [2, 4, 16, 16] -> input_size=1024
    B, C, H, W = 2, 4, 16, 16
    input_size = C * H * W
    hidden_size = 32
    output_size = 8

    x = jax.random.normal(k_x, (B, C, H, W), jnp.float32)
    w1, b1 = _torch_linear_init(k_l1, hidden_size, input_size)
    w2, b2 = _torch_linear_init(k_l2, output_size, hidden_size)

    # Optimized path: native f32 x fed to the kernel, bf16 MXU, f32 out.
    y = mlp_forward(x, w1, b1, w2, b2)
    jax.block_until_ready(y)

    x_flat = x.reshape(B, -1)

    # Tight check: reference on the SAME bf16-quantized operands with f32
    # accumulation — isolates kernel correctness from quantization error.
    xq, w1q, w2q = (a.astype(jnp.bfloat16) for a in (x_flat, w1, w2))
    hq = jax.nn.sigmoid(jnp.dot(xq, w1q.T, preferred_element_type=jnp.float32) + b1)
    yq = jnp.dot(hq.astype(jnp.bfloat16), w2q.T, preferred_element_type=jnp.float32) + b2
    assert jnp.allclose(y, yq, atol=3e-3, rtol=3e-3), "mismatch vs bf16-operand reference"

    # Loose check: full-f32 PyTorch-equivalent forward (tolerance covers bf16
    # quantization of x/W over K=1024).
    h_ref = jax.nn.sigmoid(jnp.dot(x_flat, w1.T, precision=lax.Precision.HIGHEST) + b1)
    y_ref = jnp.dot(h_ref, w2.T, precision=lax.Precision.HIGHEST) + b2
    assert jnp.allclose(y, y_ref, atol=2e-2, rtol=2e-2), "mismatch vs f32 reference"

    # Low-writeback variant: bf16 output store (lane-dense 128-wide), still f32 acc.
    y_bf16 = mlp_forward(x, w1, b1, w2, b2, out_dtype=jnp.bfloat16)
    jax.block_until_ready(y_bf16)
    assert jnp.allclose(y_bf16.astype(jnp.float32), y, atol=1e-2, rtol=1e-2), \
        "bf16-output path mismatch"

    print("KERNEL_OK")
</pallas_src>

<mosaic_0001>
module attributes {stable_mosaic.version = 11 : i64} {
  func.func @mlp_kernel(%arg0: i32, %arg1: memref<16x1024xf32, #tpu.memory_space<vmem>>, %arg2: memref<1024x128xbf16, #tpu.memory_space<vmem>>, %arg3: memref<1x128xf32, #tpu.memory_space<vmem>>, %arg4: memref<128x128xbf16, #tpu.memory_space<vmem>>, %arg5: memref<1x128xf32, #tpu.memory_space<vmem>>, %arg6: memref<16x128xf32, #tpu.memory_space<vmem>>) attributes {dimension_semantics = [#tpu.dimension_semantics<parallel>], iteration_bounds = array<i64: 1>, scalar_prefetch = 0 : i64, scratch_operands = 0 : i64, tpu.core_type = #tpu.core_type<tc>, window_params = [{transform_indices = @transform_0, window_bounds = array<i64: 16, 1024>}, {pipeline_mode = #tpu.pipeline_mode<synchronous>, transform_indices = @transform_1, window_bounds = array<i64: 1024, 128>}, {pipeline_mode = #tpu.pipeline_mode<synchronous>, transform_indices = @transform_2, window_bounds = array<i64: 1, 128>}, {pipeline_mode = #tpu.pipeline_mode<synchronous>, transform_indices = @transform_3, window_bounds = array<i64: 128, 128>}, {pipeline_mode = #tpu.pipeline_mode<synchronous>, transform_indices = @transform_4, window_bounds = array<i64: 1, 128>}, {transform_indices = @transform_5, window_bounds = array<i64: 16, 128>}]} {
    %c0 = arith.constant 0 : index
    %c0_0 = arith.constant 0 : index
    %0 = vector.load %arg1[%c0, %c0_0] : memref<16x1024xf32, #tpu.memory_space<vmem>>, vector<16x1024xf32>
    %1 = arith.truncf %0 : vector<16x1024xf32> to vector<16x1024xbf16>
    %c0_1 = arith.constant 0 : index
    %c0_2 = arith.constant 0 : index
    %2 = vector.load %arg2[%c0_1, %c0_2] : memref<1024x128xbf16, #tpu.memory_space<vmem>>, vector<1024x128xbf16>
    %cst = arith.constant dense<0.000000e+00> : vector<16x128xf32>
    %3 = tpu.matmul %1, %2, %cst {dimension_numbers = #tpu.dot_dimension_numbers<[1], [0], [0], [1], [0, 0, 1, 1], [], []>} : vector<16x1024xbf16>, vector<1024x128xbf16>, vector<16x128xf32> -> vector<16x128xf32>
    %c0_3 = arith.constant 0 : index
    %c0_4 = arith.constant 0 : index
    %4 = vector.load %arg3[%c0_3, %c0_4] : memref<1x128xf32, #tpu.memory_space<vmem>>, vector<1x128xf32>
    %5 = vector.broadcast %4 : vector<1x128xf32> to vector<16x128xf32>
    %6 = arith.addf %3, %5 : vector<16x128xf32>
    %7 = arith.negf %6 : vector<16x128xf32>
    %8 = math.exp %7 : vector<16x128xf32>
    %cst_5 = arith.constant 1.000000e+00 : f32
    %9 = vector.broadcast %cst_5 : f32 to vector<16x128xf32>
    %10 = arith.addf %9, %8 : vector<16x128xf32>
    %11 = arith.divf %9, %10 : vector<16x128xf32>
    %12 = arith.truncf %11 : vector<16x128xf32> to vector<16x128xbf16>
    %c0_6 = arith.constant 0 : index
    %c0_7 = arith.constant 0 : index
    %13 = vector.load %arg4[%c0_6, %c0_7] : memref<128x128xbf16, #tpu.memory_space<vmem>>, vector<128x128xbf16>
    %cst_8 = arith.constant dense<0.000000e+00> : vector<16x128xf32>
    %14 = tpu.matmul %12, %13, %cst_8 {dimension_numbers = #tpu.dot_dimension_numbers<[1], [0], [0], [1], [0, 0, 1, 1], [], []>} : vector<16x128xbf16>, vector<128x128xbf16>, vector<16x128xf32> -> vector<16x128xf32>
    %c0_9 = arith.constant 0 : index
    %c0_10 = arith.constant 0 : index
    %15 = vector.load %arg5[%c0_9, %c0_10] : memref<1x128xf32, #tpu.memory_space<vmem>>, vector<1x128xf32>
    %16 = vector.broadcast %15 : vector<1x128xf32> to vector<16x128xf32>
    %17 = arith.addf %14, %16 : vector<16x128xf32>
    %c0_11 = arith.constant 0 : index
    %c0_12 = arith.constant 0 : index
    %18 = vector.load %arg6[%c0_11, %c0_12] : memref<16x128xf32, #tpu.memory_space<vmem>>, vector<16x128xf32>
    tpu.vector_store %arg6[%c0_11, %c0_12], %17 {strides = array<i32>} : memref<16x128xf32, #tpu.memory_space<vmem>>, vector<16x128xf32>,
    return
  }
  func.func @transform_0(%arg0: i32) -> (i32, i32) {
    %c0_i32 = arith.constant 0 : i32
    %c0_i32_0 = arith.constant 0 : i32
    return %arg0, %c0_i32 : i32, i32
  }
  func.func @transform_1(%arg0: i32) -> (i32, i32) {
    %c0_i32 = arith.constant 0 : i32
    %c0_i32_0 = arith.constant 0 : i32
    %c0_i32_1 = arith.constant 0 : i32
    return %c0_i32, %c0_i32_0 : i32, i32
  }
  func.func @transform_2(%arg0: i32) -> (i32, i32) {
    %c0_i32 = arith.constant 0 : i32
    %c0_i32_0 = arith.constant 0 : i32
    %c0_i32_1 = arith.constant 0 : i32
    return %c0_i32, %c0_i32_0 : i32, i32
  }
  func.func @transform_3(%arg0: i32) -> (i32, i32) {
    %c0_i32 = arith.constant 0 : i32
    %c0_i32_0 = arith.constant 0 : i32
    %c0_i32_1 = arith.constant 0 : i32
    return %c0_i32, %c0_i32_0 : i32, i32
  }
  func.func @transform_4(%arg0: i32) -> (i32, i32) {
    %c0_i32 = arith.constant 0 : i32
    %c0_i32_0 = arith.constant 0 : i32
    %c0_i32_1 = arith.constant 0 : i32
    return %c0_i32, %c0_i32_0 : i32, i32
  }
  func.func @transform_5(%arg0: i32) -> (i32, i32) {
    %c0_i32 = arith.constant 0 : i32
    %c0_i32_0 = arith.constant 0 : i32
    return %arg0, %c0_i32 : i32, i32
  }
}

</mosaic_0001>

<bundles_post_ra>
// kernel: tpu_custom_call.1
= control target key start
LH: loop header
LB: loop body
LE: loop exit
PB: predicated region body
PF: predicated region fallthrough
CT: control target
= control target key end

     0   :  { %10 = vsyncpa [#allocation3], 0  ;;  %s1616_s0 = inlined_call_operand.hbm [shape: f32[2,1024], index: 0, kind: input, shape index: {}]   ;;  %s1617_s1 = inlined_call_operand.hbm [shape: bf16[1024,128], index: 1, kind: input, shape index: {}]   ;;  %s1618_s2 = inlined_call_operand.vmem [shape: f32[1,128], index: 2, kind: input, shape index: {}]   ;;  %s1619_s3 = inlined_call_operand.hbm [shape: bf16[128,128], index: 3, kind: input, shape index: {}]   ;;  %s1620_s4 = inlined_call_operand.vmem [shape: f32[1,128], index: 4, kind: input, shape index: {}]   ;;  %s1621_s5 = inlined_call_operand.hbm [shape: f32[2,128], index: 5, kind: output, shape index: {}]  }
   0x1   :  { %11 = vsyncpa [#allocation6], 0 }
   0x2   :  { %12 = vsyncpa [#allocation4], 0 }
   0x3   :  { %17 = vsyncadd [#allocation3], 1792  ;;  %s1495_s18 = smov [#allocation5]   ;;  %s1401_s22 = scalar_lea.hbm %s1617_s1, 8192 }
   0x4   :  { %s30_s19 = sshll.u32 %s1495_s18, 4  ;;  %p1402_p0 = scmp.ne.s32.totalorder %s1617_s1, %s1401_s22  ;;  %s31_s19 = int_to_ptr.vmem [resolvable:$true] %s30_s19 }
   0x5   :  { %p1405_p1 = scmp.lt.u32.totalorder %s1401_s22, %s1617_s1 }
   0x7   :  { %p1407_p2 = pnand %p1405_p1, %p1402_p0 }
   0x9   :  { %1410 = shalt.err (!%p1407_p2)
}
   0xa   :  { %s1411_s27 = scalar_lea.vmem %s31_s19, 8192  ;;  %p1416_p4 = scmp.lt.s32.totalorder %s31_s19, %s31_s19 }
   0xb   :  { %p1412_p3 = scmp.ne.s32.totalorder %s31_s19, %s1411_s27  ;;  %p1417_p5 = scmp.lt.s32.totalorder %s1411_s27, %s1411_s27 }
   0xd   :  { %p1418_p6 = por %p1417_p5, %p1416_p4 }
   0xf   :  { %p1419_p7 = pnand %p1418_p6, %p1412_p3 }
  0x11   :  { %1422 = shalt.err (!%p1419_p7)
}
  0x12   :  { %s1496_s28 = smov 64   ;;  %s1497_s29 = smov 4  }
  0x13   :  { %36 = dma.hbm_to_vmem [thread:$0]  %s1617_s1, 8192, %s31_s19, [#allocation6], %s1496_s28, %s1496_s28, %s1497_s29  }
  0x14   :  { %s1498_s7 = smov [#allocation2]   ;;  %s1423_s11 = scalar_lea.hbm %s1616_s0, 256 }
  0x15   :  { %s18_s8 = sshll.u32 %s1498_s7, 4  ;;  %p1424_p8 = scmp.ne.s32.totalorder %s1616_s0, %s1423_s11  ;;  %s19_s8 = int_to_ptr.vmem [resolvable:$true] %s18_s8 }
  0x16   :  { %p1427_p9 = scmp.lt.u32.totalorder %s1423_s11, %s1616_s0 }
  0x18   :  { %p1429_p10 = pnand %p1427_p9, %p1424_p8 }
  0x1a   :  { %1432 = shalt.err (!%p1429_p10)
}
  0x1b   :  { %s1433_s16 = scalar_lea.vmem %s19_s8, 256  ;;  %s1437_s1 = scalar_lea.vmem %s19_s8, 2048 }
  0x1c   :  { %p1434_p11 = scmp.ne.s32.totalorder %s19_s8, %s1433_s16  ;;  %p1438_p12 = scmp.lt.s32.totalorder %s19_s8, %s19_s8 }
  0x1d   :  { %p1439_p13 = scmp.lt.s32.totalorder %s1437_s1, %s1433_s16 }
  0x1f   :  { %p1440_p0 = por %p1439_p13, %p1438_p12 }
  0x21   :  { %p1441_p1 = pnand %p1440_p0, %p1434_p11 }
  0x23   :  { %1444 = shalt.err (!%p1441_p1)
}
  0x24   :  { %s1499_s17 = smov 256   ;;  %s1500_s18 = smov 16  }
  0x25   :  { %24 = dma.hbm_to_vmem [thread:$0]  %s1616_s0, 256, %s19_s8, [#allocation3], %s1499_s17, %s1499_s17, %s1500_s18  }
  0x26   :  { %s1501_s21 = smov [#allocation7]   ;;  %s1445_s25 = scalar_lea.hbm %s1619_s3, 1024 }
  0x27   :  { %s44_s22 = sshll.u32 %s1501_s21, 4  ;;  %p1446_p2 = scmp.ne.s32.totalorder %s1619_s3, %s1445_s25  ;;  %s45_s22 = int_to_ptr.vmem [resolvable:$true] %s44_s22 }
  0x28   :  { %p1449_p3 = scmp.lt.u32.totalorder %s1445_s25, %s1619_s3 }
  0x2a   :  { %p1451_p4 = pnand %p1449_p3, %p1446_p2 }
  0x2c   :  { %1454 = shalt.err (!%p1451_p4)
}
  0x2d   :  { %s1455_s7 = scalar_lea.vmem %s45_s22, 1024  ;;  %p1460_p6 = scmp.lt.s32.totalorder %s45_s22, %s45_s22 }
  0x2e   :  { %p1456_p5 = scmp.ne.s32.totalorder %s45_s22, %s1455_s7  ;;  %p1461_p7 = scmp.lt.s32.totalorder %s1455_s7, %s1455_s7 }
  0x30   :  { %p1462_p8 = por %p1461_p7, %p1460_p6 }
  0x32   :  { %p1463_p9 = pnand %p1462_p8, %p1456_p5 }
  0x34   :  { %1466 = shalt.err (!%p1463_p9)
}
  0x35   :  { %50 = dma.hbm_to_vmem [thread:$0]  %s1619_s3, 1024, %s45_s22, [#allocation6], %s1496_s28, %s1496_s28, %s1497_s29  }
  0x36   :  { %1489 = dma.done.wait [#allocation3], 2048  }
  0x37   :  { %1490 = vsyncadd [#allocation3], 4294965248 }
  0x38   :  { %1491 = dma.done.wait [#allocation6], 9216  }
  0x39   :  { %1492 = vsyncadd [#allocation6], 4294958080  ;;  %v1297_v0 = vld [vmem:[#allocation5 + $0x40] sm:$0xff]   ;;  %v1301_v4 = vld [vmem:[#allocation5 + $0x48] sm:$0xff]   ;;  %v1502_v25 = vmov 1983009808   ;;  %v102_v27 = vlaneseq }
  0x3a   :  { %v1298_v1 = vld [vmem:[#allocation5 + $0xc0] sm:$0xff]   ;;  %1167 = vmatprep.subr.bf16.mxu0 %v1297_v0  ;;  %v1302_v5 = vld [vmem:[#allocation5 + $0xc8] sm:$0xff]   ;;  %v1305_v8 = vld [vmem:[#allocation5 + $0x50] sm:$0xff]   ;;  %v100_v26 = vunpack.c.l.s4 %v1502_v25  ;;  %vm1504_vm0 = vmmov 0  }
  0x3b   :  { %v1299_v2 = vld [vmem:[#allocation5] sm:$0xff]   ;;  %1189 = vmatprep.subr.bf16.mxu1 %v1298_v1  ;;  %v1303_v6 = vld [vmem:[#allocation5 + $0x8] sm:$0xff]   ;;  %v1306_v9 = vld [vmem:[#allocation5 + $0xd0] sm:$0xff]   ;;  %v103_v33 = vshrl.u32 %v102_v27, 7 }
  0x3c   :  { %v1300_v3 = vld [vmem:[#allocation5 + $0x80] sm:$0xff]   ;;  %1168 = vmatpush3.bf16.msra.mxu0 %v1299_v2  ;;  %v1304_v7 = vld [vmem:[#allocation5 + $0x88] sm:$0xff]   ;;  %v1307_v10 = vld [vmem:[#allocation5 + $0x10] sm:$0xff]   ;;  %v101_v32 = vunpack.c.0.s8 %v100_v26 }
  0x3d   :  { %1190 = vmatpush3.bf16.msra.mxu1 %v1300_v3  ;;  %1169 = vmatprep.subr.bf16.mxu0 %v1301_v4  ;;  %v1308_v11 = vld [vmem:[#allocation5 + $0x90] sm:$0xff]   ;;  %v1309_v12 = vld [vmem:[#allocation5 + $0x58] sm:$0xff]   ;;  %v1313_v16 = vld [vmem:[#allocation5 + $0x60] sm:$0xff]  }
  0x3e   :  { %1191 = vmatprep.subr.bf16.mxu1 %v1302_v5  ;;  %v1310_v13 = vld [vmem:[#allocation5 + $0xd8] sm:$0xff]   ;;  %v1314_v17 = vld [vmem:[#allocation5 + $0xe0] sm:$0xff]   ;;  %v1317_v20 = vld [vmem:[#allocation5 + $0x68] sm:$0xff]   ;;  %v1580_v37 = vsub.s32 %v101_v32, %v103_v33 }
  0x3f   :  { %v1311_v14 = vld [vmem:[#allocation5 + $0x18] sm:$0xff]   ;;  %v1315_v18 = vld [vmem:[#allocation5 + $0x20] sm:$0xff]   ;;  %v1318_v21 = vld [vmem:[#allocation5 + $0xe8] sm:$0xff]  }
  0x40   :  { %1170 = vmatpush3.bf16.msra.mxu0 %v1303_v6  ;;  %v1312_v15 = vld [vmem:[#allocation5 + $0x98] sm:$0xff]   ;;  %v1316_v19 = vld [vmem:[#allocation5 + $0xa0] sm:$0xff]   ;;  %v1319_v22 = vld [vmem:[#allocation5 + $0x28] sm:$0xff]  }
  0x41   :  { %1192 = vmatpush3.bf16.msra.mxu1 %v1304_v7  ;;  %1171 = vmatprep.subr.bf16.mxu0 %v1305_v8  ;;  %v1320_v23 = vld [vmem:[#allocation5 + $0xa8] sm:$0xff]   ;;  %v1321_v24 = vld [vmem:[#allocation5 + $0x70] sm:$0xff]   ;;  %v1325_v31 = vld [vmem:[#allocation5 + $0x78] sm:$0xff]  }
  0x42   :  { %1193 = vmatprep.subr.bf16.mxu1 %v1306_v9  ;;  %v1322_v28 = vld [vmem:[#allocation5 + $0xf0] sm:$0xff]   ;;  %v1326_v34 = vld [vmem:[#allocation5 + $0xf8] sm:$0xff]   ;;  %v1341_v53 = vld [vmem:[#allocation5 + $0x140] sm:$0xff]  }
  0x43   :  { %v1323_v29 = vld [vmem:[#allocation5 + $0x30] sm:$0xff]   ;;  %v1327_v35 = vld [vmem:[#allocation5 + $0x38] sm:$0xff]   ;;  %v1342_v58 = vld [vmem:[#allocation5 + $0x1c0] sm:$0xff]  }
  0x44   :  { %1172 = vmatpush3.bf16.msra.mxu0 %v1307_v10  ;;  %v1324_v30 = vld [vmem:[#allocation5 + $0xb0] sm:$0xff]   ;;  %v1328_v36 = vld [vmem:[#allocation5 + $0xb8] sm:$0xff]   ;;  %v1343_v62 = vld [vmem:[#allocation5 + $0x100] sm:$0xff]  }
  0x45   :  { %1194 = vmatpush3.bf16.msra.mxu1 %v1308_v11  ;;  %1173 = vmatprep.subr.bf16.mxu0 %v1309_v12  ;;  %v1329_v38 = vld [vmem:[#allocation2] ss:$16 sps:$4 sm:$0xff]   ;;  %v1337_v43 = vld [vmem:[#allocation2 + $0x4] ss:$16 sps:$4 sm:$0xff]   ;;  %v1345_v4 = vld [vmem:[#allocation5 + $0x148] sm:$0xff]  }
  0x46   :  { %1195 = vmatprep.subr.bf16.mxu1 %v1310_v13  ;;  %v1331_v39 = vld [vmem:[#allocation2 + $0x20] ss:$16 sps:$4 sm:$0xff]   ;;  %v105_v42 = vrot.slane %v1329_v38, %v1580_v37  ;;  %v1338_v44 = vld [vmem:[#allocation2 + $0x24] ss:$16 sps:$4 sm:$0xff]   ;;  %v112_v50 = vrot.slane %v1337_v43, %v1580_v37  ;;  %v1346_v7 = vld [vmem:[#allocation5 + $0x1c8] sm:$0xff]  }
  0x47   :  { %v1333_v40 = vld [vmem:[#allocation2 + $0x40] ss:$16 sps:$4 sm:$0xff]   ;;  %v1339_v45 = vld [vmem:[#allocation2 + $0x44] ss:$16 sps:$4 sm:$0xff]   ;;  %v119_v46 = vrot.slane %v1331_v39, %v1580_v37  ;;  %v126_v51 = vrot.slane %v1338_v44, %v1580_v37  ;;  %v1347_v8 = vld [vmem:[#allocation5 + $0x108] sm:$0xff]  }
  0x48   :  { %1174 = vmatpush3.bf16.msra.mxu0 %v1311_v14  ;;  %v1335_v41 = vld [vmem:[#allocation2 + $0x60] ss:$16 sps:$4 sm:$0xff]   ;;  %v177_v47 = vrot.slane %v1333_v40, %v1580_v37  ;;  %v1340_v49 = vld [vmem:[#allocation2 + $0x64] ss:$16 sps:$4 sm:$0xff]   ;;  %v184_v52 = vrot.slane %v1339_v45, %v1580_v37  ;;  %v1348_v9 = vld [vmem:[#allocation5 + $0x188] sm:$0xff]  }
  0x49   :  { %1196 = vmatpush3.bf16.msra.mxu1 %v1312_v15  ;;  %1175 = vmatprep.subr.bf16.mxu0 %v1313_v16  ;;  %v191_v48 = vrot.slane %v1335_v41, %v1580_v37  ;;  %v128_v54 = vcombine.high %v105_v42, %v119_v46  ;;  %v198_v56 = vrot.slane %v1340_v49, %v1580_v37  ;;  %v1344_v2 = vld [vmem:[#allocation5 + $0x180] sm:$0xff]   ;;  %v1349_v10 = vld [vmem:[#allocation5 + $0x150] sm:$0xff]   ;;  %v1353_v14 = vld [vmem:[#allocation5 + $0x158] sm:$0xff]  }
  0x4a   :  { %1197 = vmatprep.subr.bf16.mxu1 %v1314_v17  ;;  %v127_v57 = vcombine.low %v105_v42, %v119_v46  ;;  %v130_v59 = vcombine.high %v112_v50, %v126_v51  ;;  %v129_v61 = vcombine.low %v112_v50, %v126_v51  ;;  %v1350_v11 = vld [vmem:[#allocation5 + $0x1d0] sm:$0xff]   ;;  %v1354_v15 = vld [vmem:[#allocation5 + $0x1d8] sm:$0xff]   ;;  %v1364_v25 = vld [vmem:[#allocation5 + $0x1a8] sm:$0xff]  }
  0x4b   :  { %v200_v55 = vcombine.high %v177_v47, %v191_v48  ;;  %v199_v60 = vcombine.low %v177_v47, %v191_v48  ;;  %v202_v0 = vcombine.high %v184_v52, %v198_v56  ;;  %v201_v1 = vcombine.low %v184_v52, %v198_v56  ;;  %v1351_v12 = vld [vmem:[#allocation5 + $0x110] sm:$0xff]   ;;  %v1355_v16 = vld [vmem:[#allocation5 + $0x118] sm:$0xff]  }
  0x4c   :  { %1176 = vmatpush3.bf16.msra.mxu0 %v1315_v18  ;;  %v1352_v13 = vld [vmem:[#allocation5 + $0x190] sm:$0xff]   ;;  %v1356_v17 = vld [vmem:[#allocation5 + $0x198] sm:$0xff]   ;;  %v1357_v18 = vld [vmem:[#allocation5 + $0x160] sm:$0xff]  }
  0x4d   :  { %1198 = vmatpush3.bf16.msra.mxu1 %v1316_v19  ;;  %1177 = vmatprep.subr.bf16.mxu0 %v1317_v20  ;;  %v256_v63 = vpack.c.bf16 %v200_v55, %v128_v54  ;;  %v255_v3 = vpack.c.bf16 %v199_v60, %v127_v57  ;;  %v258_v5 = vpack.c.bf16 %v202_v0, %v130_v59  ;;  %v1358_v19 = vld [vmem:[#allocation5 + $0x1e0] sm:$0xff]   ;;  %v1365_v26 = vld [vmem:[#allocation5 + $0x170] sm:$0xff]   ;;  %v1371_v32 = vld [vmem:[#allocation5 + $0x138] sm:$0xff]   ;;  %v1503_v0 = vmov 0.0  }
  0x4e   :  { %1199 = vmatprep.subr.bf16.mxu1 %v1318_v21  ;;  %v257_v6 = vpack.c.bf16 %v201_v1, %v129_v61  ;;  %v1359_v20 = vld [vmem:[#allocation5 + $0x120] sm:$0xff]   ;;  %v1366_v27 = vld [vmem:[#allocation5 + $0x1f0] sm:$0xff]   ;;  %v1372_v33 = vld [vmem:[#allocation5 + $0x1b8] sm:$0xff]  }
  0x4f   :  { %814 = vmatprep.mubr.bf16.mxu0 %v256_v63  ;;  %855 = vmatprep.mubr.bf16.mxu1 %v258_v5  ;;  %v1360_v21 = vld [vmem:[#allocation5 + $0x1a0] sm:$0xff]   ;;  %v1379_v38 = vld [vmem:[#allocation2 + $0x68] ss:$16 sps:$4 sm:$0xff]   ;;  %v1381_v39 = vld [vmem:[#allocation2 + $0xc] ss:$16 sps:$4 sm:$0xff]  }
  0x50   :  { %1178 = vmatpush3.bf16.msra.mxu0 %v1319_v22  ;;  %v1361_v22 = vld [vmem:[#allocation5 + $0x168] sm:$0xff]   ;;  %v227_v46 = vrot.slane %v1379_v38, %v1580_v37  ;;  %v148_v47 = vrot.slane %v1381_v39, %v1580_v37  ;;  %v1385_v63 = vld [vmem:[#allocation7] sm:$0xff]   ;;  %v1387_v1 = vld [vmem:[#allocation7 + $0x10] sm:$0xff]  }
  0x51   :  { %1200 = vmatpush3.bf16.msra.mxu1 %v1320_v23  ;;  %1179 = vmatprep.subr.bf16.mxu0 %v1321_v24  ;;  %v1362_v23 = vld [vmem:[#allocation5 + $0x1e8] sm:$0xff]   ;;  %v1391_v5 = vld [vmem:[#allocation7 + $0x30] sm:$0xff]  }
  0x52   :  { %1201 = vmatprep.subr.bf16.mxu1 %v1322_v28  ;;  %v1363_v24 = vld [vmem:[#allocation5 + $0x128] sm:$0xff]   ;;  %v1367_v28 = vld [vmem:[#allocation5 + $0x130] sm:$0xff]  }
  0x53   :  { %v1382_v40 = vld [vmem:[#allocation2 + $0x2c] ss:$16 sps:$4 sm:$0xff]  }
  0x54   :  { %1180 = vmatpush3.bf16.msra.mxu0 %v1323_v29  ;;  %v1368_v29 = vld [vmem:[#allocation5 + $0x1b0] sm:$0xff]   ;;  %v1383_v44 = vld [vmem:[#allocation2 + $0x4c] ss:$16 sps:$4 sm:$0xff]   ;;  %v162_v48 = vrot.slane %v1382_v40, %v1580_v37 }
  0x55   :  { %1202 = vmatpush3.bf16.msra.mxu1 %v1324_v30  ;;  %1181 = vmatprep.subr.bf16.mxu0 %v1325_v31  ;;  %v1369_v30 = vld [vmem:[#allocation5 + $0x178] sm:$0xff]   ;;  %v220_v50 = vrot.slane %v1383_v44, %v1580_v37 }
  0x56   :  { %1203 = vmatprep.subr.bf16.mxu1 %v1326_v34  ;;  %v1370_v31 = vld [vmem:[#allocation5 + $0x1f8] sm:$0xff]   ;;  %v166_v54 = vcombine.high %v148_v47, %v162_v48  ;;  %v165_v56 = vcombine.low %v148_v47, %v162_v48 }
  0x57   :  { %v1373_v34 = vld [vmem:[#allocation2 + $0x8] ss:$16 sps:$4 sm:$0xff]   ;;  %v1384_v45 = vld [vmem:[#allocation2 + $0x6c] ss:$16 sps:$4 sm:$0xff]  }
  0x58   :  { %1182 = vmatpush3.bf16.msra.mxu0 %v1327_v35  ;;  %v1375_v35 = vld [vmem:[#allocation2 + $0x28] ss:$16 sps:$4 sm:$0xff]   ;;  %v141_v41 = vrot.slane %v1373_v34, %v1580_v37  ;;  %v234_v51 = vrot.slane %v1384_v45, %v1580_v37 }
  0x59   :  { %1204 = vmatpush3.bf16.msra.mxu1 %v1328_v36  ;;  %1211 = vmatprep.subr.bf16.mxu0 %v1341_v53  ;;  %v1377_v36 = vld [vmem:[#allocation2 + $0x48] ss:$16 sps:$4 sm:$0xff]   ;;  %v155_v42 = vrot.slane %v1375_v35, %v1580_v37 }
  0x5a   :  { %1233 = vmatprep.subr.bf16.mxu1 %v1342_v58  ;;  %v213_v43 = vrot.slane %v1377_v36, %v1580_v37  ;;  %v238_v57 = vcombine.high %v220_v50, %v234_v51  ;;  %v237_v58 = vcombine.low %v220_v50, %v234_v51  ;;  %v1386_v37 = vld [vmem:[#allocation7 + $0x8] sm:$0xff]   ;;  %v1158_v50 = vld [vmem:[%s1620_s4] ss:$0 sm:$0xff] }
  0x5b   :  { %815 = vmatmul.mubr.bf16.vlgmr.msra.gmra.mrb[0].mxu0 %v255_v3  ;;  %v164_v49 = vcombine.high %v141_v41, %v155_v42  ;;  %v163_v52 = vcombine.low %v141_v41, %v155_v42  ;;  %v1389_v3 = vld [vmem:[#allocation7 + $0x20] sm:$0xff]  }
  0x5c   :  { %1212 = vmatpush3.bf16.msra.mxu0 %v1343_v62  ;;  %856 = vmatmul.mubr.bf16.vlgmr.msra.gmra.mrb[0].mxu1 %v257_v6  ;;  %v236_v53 = vcombine.high %v213_v43, %v227_v46  ;;  %v235_v55 = vcombine.low %v213_v43, %v227_v46  ;;  %v262_v61 = vpack.c.bf16 %v238_v57, %v166_v54  ;;  %v1392_v6 = vld [vmem:[#allocation7 + $0x38] sm:$0xff]  }
  0x5d   :  { %1213 = vmatprep.subr.bf16.mxu0 %v1345_v4  ;;  %1234 = vmatpush3.bf16.msra.mxu1 %v1344_v2  ;;  %v261_v62 = vpack.c.bf16 %v237_v58, %v165_v56  ;;  %v1388_v2 = vld [vmem:[#allocation7 + $0x18] sm:$0xff]   ;;  %v1390_v4 = vld [vmem:[#allocation7 + $0x28] sm:$0xff]  }
  0x5e   :  { %1235 = vmatprep.subr.bf16.mxu1 %v1346_v7  ;;  %v260_v59 = vpack.c.bf16 %v236_v53, %v164_v49  ;;  %v259_v60 = vpack.c.bf16 %v235_v55, %v163_v52  ;;  %937 = vmatprep.mubr.bf16.mxu1 %v262_v61 }
  0x60   :  { %1214 = vmatpush3.bf16.msra.mxu0 %v1347_v8  ;;  %896 = vmatprep.mubr.bf16.mxu0 %v260_v59  ;;  %v1091_v8 = vld [vmem:[%s1618_s2] ss:$0 sm:$0xff] }
  0x61   :  { %1215 = vmatprep.subr.bf16.mxu0 %v1349_v10  ;;  %1236 = vmatpush3.bf16.msra.mxu1 %v1348_v9 }
  0x62   :  { %1237 = vmatprep.subr.bf16.mxu1 %v1350_v11 }
  0x64   :  { %1216 = vmatpush3.bf16.msra.mxu0 %v1351_v12 }
  0x65   :  { %1217 = vmatprep.subr.bf16.mxu0 %v1353_v14  ;;  %1238 = vmatpush3.bf16.msra.mxu1 %v1352_v13 }
  0x66   :  { %1239 = vmatprep.subr.bf16.mxu1 %v1354_v15 }
  0x68   :  { %1218 = vmatpush3.bf16.msra.mxu0 %v1355_v16 }
  0x69   :  { %1219 = vmatprep.subr.bf16.mxu0 %v1357_v18  ;;  %1240 = vmatpush3.bf16.msra.mxu1 %v1356_v17 }
  0x6a   :  { %1241 = vmatprep.subr.bf16.mxu1 %v1358_v19 }
  0x6c   :  { %1220 = vmatpush3.bf16.msra.mxu0 %v1359_v20 }
  0x6d   :  { %1221 = vmatprep.subr.bf16.mxu0 %v1361_v22  ;;  %1242 = vmatpush3.bf16.msra.mxu1 %v1360_v21 }
  0x6e   :  { %1243 = vmatprep.subr.bf16.mxu1 %v1362_v23 }
  0x70   :  { %1222 = vmatpush3.bf16.msra.mxu0 %v1363_v24 }
  0x71   :  { %1223 = vmatprep.subr.bf16.mxu0 %v1365_v26  ;;  %1244 = vmatpush3.bf16.msra.mxu1 %v1364_v25 }
  0x72   :  { %1245 = vmatprep.subr.bf16.mxu1 %v1366_v27 }
  0x74   :  { %1224 = vmatpush3.bf16.msra.mxu0 %v1367_v28 }
  0x75   :  { %1225 = vmatprep.subr.bf16.mxu0 %v1369_v30  ;;  %1246 = vmatpush3.bf16.msra.mxu1 %v1368_v29 }
  0x76   :  { %1247 = vmatprep.subr.bf16.mxu1 %v1370_v31 }
  0x78   :  { %1226 = vmatpush3.bf16.msra.mxu0 %v1371_v32 }
  0x79   :  { %1248 = vmatpush3.bf16.msra.mxu1 %v1372_v33  ;;  %1264 = vmatprep.subr.bf16.mxu0 %v1503_v0 }
  0x7b   :  { %897 = vmatmul.mubr.bf16.vlgmr.msra.gmra.mrb[4].mxu0 %v259_v60 }
  0x7c   :  { %938 = vmatmul.mubr.bf16.vlgmr.msra.gmra.mrb[4].mxu1 %v261_v62  ;;  %1265 = vmatpush3.bf16.msra.mxu0 %v1385_v63 }
  0x7d   :  { %1266 = vmatprep.subr.bf16.mxu0 %v1503_v0  ;;  %1280 = vmatprep.mubr.msk.bf16.mxu0 %vm1504_vm0, %v1503_v0 }
  0x80   :  { %1267 = vmatpush3.bf16.msra.mxu0 %v1386_v37 }
  0x81   :  { %1268 = vmatprep.subr.bf16.mxu0 %v1503_v0 }
  0x84   :  { %1269 = vmatpush3.bf16.msra.mxu0 %v1387_v1 }
  0x85   :  { %1270 = vmatprep.subr.bf16.mxu0 %v1503_v0 }
  0x88   :  { %1271 = vmatpush3.bf16.msra.mxu0 %v1388_v2 }
  0x89   :  { %1272 = vmatprep.subr.bf16.mxu0 %v1503_v0 }
  0x8c   :  { %1273 = vmatpush3.bf16.msra.mxu0 %v1389_v3 }
  0x8d   :  { %1274 = vmatprep.subr.bf16.mxu0 %v1503_v0 }
  0x90   :  { %1275 = vmatpush3.bf16.msra.mxu0 %v1390_v4 }
  0x91   :  { %1276 = vmatprep.subr.bf16.mxu0 %v1503_v0 }
  0x94   :  { %1277 = vmatpush3.bf16.msra.mxu0 %v1391_v5 }
  0x95   :  { %1278 = vmatprep.subr.bf16.mxu0 %v1503_v0 }
  0x98   :  { %1279 = vmatpush3.bf16.msra.mxu0 %v1392_v6 }
 0x12e   :  { %v1183_v7 = vpop.f32.mrb[0].mxu0 }
 0x12f   :  { %v1184_v9 = vpop.f32.mrb[1].mxu0  ;;  %v1205_v10 = vpop.f32.mrb[0].mxu1 }
 0x130   :  { %v1185_v11 = vadd.f32 %v1184_v9, %v1183_v7  ;;  %v1186_v12 = vpop.f32.mrb[2].mxu0  ;;  %v1206_v13 = vpop.f32.mrb[1].mxu1 }
 0x131   :  { %v1187_v14 = vpop.f32.mrb[3].mxu0  ;;  %v1207_v16 = vadd.f32 %v1206_v13, %v1205_v10  ;;  %v1208_v17 = vpop.f32.mrb[2].mxu1 }
 0x132   :  { %v817_v15 = vadd.f32 %v1185_v11, %v1091_v8  ;;  %v1188_v18 = vadd.f32 %v1187_v14, %v1186_v12  ;;  %v1209_v19 = vpop.f32.mrb[3].mxu1 }
 0x133   :  { %v1210_v22 = vadd.f32 %v1209_v19, %v1208_v17 }
 0x134   :  { %v858_v20 = vadd.f32 %v1207_v16, %v817_v15  ;;  %v820_v21 = vadd.f32 %v1188_v18, %v1091_v8 }
 0x136   :  { %v861_v23 = vadd.f32 %v1210_v22, %v820_v21 }
 0x14e   :  { %v1227_v24 = vpop.f32.mrb[4].mxu0 }
 0x14f   :  { %v1249_v25 = vpop.f32.mrb[4].mxu1  ;;  %v1228_v26 = vpop.f32.mrb[5].mxu0 }
 0x150   :  { %v1229_v27 = vadd.f32 %v1228_v26, %v1227_v24  ;;  %v1250_v28 = vpop.f32.mrb[5].mxu1  ;;  %v1230_v29 = vpop.f32.mrb[6].mxu0 }
 0x151   :  { %v1251_v30 = vadd.f32 %v1250_v28, %v1249_v25  ;;  %v1252_v31 = vpop.f32.mrb[6].mxu1  ;;  %v1231_v32 = vpop.f32.mrb[7].mxu0 }
 0x152   :  { %v899_v33 = vadd.f32 %v1229_v27, %v858_v20  ;;  %v1232_v34 = vadd.f32 %v1231_v32, %v1230_v29  ;;  %v1253_v35 = vpop.f32.mrb[7].mxu1 }
 0x153   :  { %v1254_v36 = vadd.f32 %v1253_v35, %v1252_v31 }
 0x154   :  { %v940_v38 = vadd.f32 %v1251_v30, %v899_v33  ;;  %v902_v39 = vadd.f32 %v1232_v34, %v861_v23 }
 0x156   :  { %v1156_v40 = vmul.f32 -1.442695, %v940_v38  ;;  %v943_v41 = vadd.f32 %v1254_v36, %v902_v39 }
 0x158   :  { %1393 = vpow2.f32 %v1156_v40  ;;  %v1157_v42 = vmul.f32 -1.442695, %v943_v41 }
 0x15a   :  { %1395 = vpow2.f32 %v1157_v42 }
 0x162   :  { %v1394_v43 = vpop.eup %1393 }
 0x163   :  { %v952_v44 = vadd.f32 1.0, %v1394_v43 }
 0x164   :  { %v1396_v45 = vpop.eup %1395 }
 0x165   :  { %v953_v46 = vadd.f32 1.0, %v1396_v45  ;;  %1397 = vrcp.f32 %v952_v44 }
 0x167   :  { %1399 = vrcp.f32 %v953_v46 }
 0x16f   :  { %v1398_v47 = vpop.eup %1397 }
 0x171   :  { %v1400_v48 = vpop.eup %1399 }
 0x172   :  { %v958_v49 = vpack.c.bf16 %v1400_v48, %v1398_v47 }
 0x174   :  { %1281 = vmatmul.mubr.bf16.vlgmr.msra.gmra.mrb[8].mxu0 %v958_v49 }
 0x247   :  { %v1064_v51 = vpop.f32.mrb[8].mxu0 }
 0x248   :  { %v1065_v52 = vadd.f32 %v1158_v50, %v1064_v51  ;;  %v1282_v53 = vpop.f32.mrb[9].mxu0 }
 0x249   :  { %v1067_v54 = vpop.f32.mrb[10].mxu0 }
 0x24a   :  { %1071 = vst [vmem:[#allocation8] sm:$0xff] %v1065_v52  ;;  %v1068_v55 = vadd.f32 %v1158_v50, %v1067_v54  ;;  %v1283_v56 = vpop.f32.mrb[11].mxu0 }
 0x24c   :  { %1072 = vst [vmem:[#allocation8 + $0x8] sm:$0xff] %v1068_v55 }
 0x24d   :  { %1077 = vsyncadd [#allocation4], 224  ;;  %s1505_s9 = smov [#allocation8]  }
 0x24e   :  { %s1078_s10 = sshll.u32 %s1505_s9, 4  ;;  %s1079_s10 = int_to_ptr.vmem [resolvable:$true] %s1078_s10 }
 0x24f   :  { %s1467_s11 = scalar_lea.vmem %s1079_s10, 32  ;;  %s1471_s12 = scalar_lea.vmem %s1079_s10, 256 }
 0x250   :  { %p1468_p10 = scmp.ne.s32.totalorder %s1079_s10, %s1467_s11  ;;  %p1472_p11 = scmp.lt.s32.totalorder %s1079_s10, %s1079_s10 }
 0x251   :  { %p1473_p12 = scmp.lt.s32.totalorder %s1471_s12, %s1467_s11 }
 0x253   :  { %p1474_p13 = por %p1473_p12, %p1472_p11 }
 0x255   :  { %p1475_p0 = pnand %p1474_p13, %p1468_p10 }
 0x257   :  { %1478 = shalt.err (!%p1475_p0)
}
 0x258   :  { %s1479_s14 = scalar_lea.hbm %s1621_s5, 32 }
 0x259   :  { %p1480_p1 = scmp.ne.s32.totalorder %s1621_s5, %s1479_s14  ;;  %p1483_p2 = scmp.lt.u32.totalorder %s1479_s14, %s1621_s5 }
 0x25b   :  { %p1485_p3 = pnand %p1483_p2, %p1480_p1 }
 0x25d   :  { %1488 = shalt.err (!%p1485_p3)
}
 0x25e   :  { %s1506_s18 = smov 32   ;;  %s1507_s19 = smov 2  }
 0x25f   :  { %1084 = dma.vmem_to_hbm [thread:$0]  %s1079_s10, 32, %s1621_s5, [#allocation4], %s1506_s18, %s1506_s18, %s1507_s19  }
 0x260   :  { %1493 = dma.done.wait [#allocation4], 256  }
 0x261   :  { %1494 = vsyncadd [#allocation4], 4294967040 }
 0x262   :  { %1088 = vsyncpa [#allocation3], 1 }
 0x263   :  { %1089 = vsyncpa [#allocation6], 1 }
 0x264   :  { %1090 = vsyncpa [#allocation4], 1 }

</bundles_post_ra>
